<compile_context>
chip_gen: v6e
topology: v6e:2x2x1
jax: 0.10.0
libtpu: 0.0.40
codegen_flags: <defaults>
</compile_context>

<pallas_src>
import functools
import math

import jax
import jax.numpy as jnp
from jax.experimental import pallas as pl
from jax.experimental.pallas import tpu as pltpu


def _rmsnorm_kernel(x_ref, w_ref, o_ref, *, eps, inv_d, fast_scale):
    # x_ref: (block_rows, d_model), w_ref: (1, d_model), o_ref like x_ref.

    # Pass 1: f32 sum-of-squares reduction -> per-row inverse RMS.
    xf = x_ref[...].astype(jnp.float32)
    ss = jnp.sum(xf * xf, axis=-1, keepdims=True)        # single XLU reduce
    inv = jax.lax.rsqrt(ss * inv_d + eps)                 # EUP rsqrt (free slot)

    if fast_scale:
        # bf16 inputs: scale pass in packed bf16 VALU (no f32 casts of the full
        # tile).  Harmless on v5e (lowered back through f32), a VALU win on
        # v6e/v7x where HBM feeds ~800 Gelem/s.
        dt = x_ref.dtype
        o_ref[...] = (x_ref[...] * w_ref[...].astype(dt)) * inv.astype(dt)
    else:
        # f32 / other dtypes: reuse the pass-1 f32 copy for the scale pass.
        w = w_ref[...].astype(jnp.float32)                 # grid-invariant tile
        o_ref[...] = (xf * inv * w).astype(o_ref.dtype)


def _tpu_vmem_capacity_bytes():
    # v5e/v6e: 128 MiB physical VMEM, v7x: 64 MiB.  If the query fails, assume
    # the smallest part (v7x) so tiles always fit.
    try:
        cap = int(pltpu.get_tpu_info().vmem_capacity_bytes)
    except Exception:
        cap = 64 << 20
    return min(cap, 128 << 20)


def rmsnorm(x, weight, eps=1e-5, block_rows=None, vmem_limit_bytes=None):
    """RMSNorm over the last axis of x, scaled by weight (shape (d_model,)).

    eps=1e-5 matches the PyTorch module's default.
    """
    orig_shape = x.shape
    d_model = orig_shape[-1]
    rows = math.prod(orig_shape[:-1]) if orig_shape[:-1] else 1
    x2d = x.reshape(rows, d_model)
    w2d = weight.reshape(1, d_model)

    itemsize = jnp.dtype(x.dtype).itemsize
    sublane = max(8, 32 // max(itemsize, 1))   # 8 (f32), 16 (bf16), 32 (i8/fp8)

    if vmem_limit_bytes is None:
        vmem_limit_bytes = (_tpu_vmem_capacity_bytes() * 3) // 4  # 48 MiB v7x / 96 MiB v5e,v6e

    if block_rows is None:
        # VMEM per row per step: double-buffered x+out tiles (4*itemsize) plus
        # ~2 f32 working tiles of in-kernel temporaries (conservative).
        sizing_budget = (vmem_limit_bytes * 5) // 6
        bytes_per_row = d_model * (4 * itemsize + 8)
        rows_for_vmem = sizing_budget // max(bytes_per_row, 1)
        # Traffic target: >= ~12 MiB of x+out per grid step keeps the ~0.35 us
        # fixed per-step overhead small even at v7x HBM rates, without
        # over-allocating VMEM for narrow models (v5e note).
        traffic_target = 12 << 20
        rows_for_traffic = traffic_target // max(2 * d_model * itemsize, 1)
        block_rows = int(min(rows_for_traffic, rows_for_vmem))

    if block_rows >= rows:
        block_rows = rows           # full-extent block: exempt from (8,128) rule
    else:
        block_rows = max(sublane, (block_rows // sublane) * sublane)

    grid = (pl.cdiv(rows, block_rows),)
    # TODO(synk): for very wide models (d_model >= ~32-64K) add a second
    # "arbitrary" grid axis over d_model with a pl.when-init/finalize partial
    # sum-of-squares scratch, so per-step traffic stays large instead of
    # block_rows collapsing toward the sublane minimum on 64 MiB-VMEM parts.

    fast_scale = x.dtype == jnp.bfloat16
    kernel = functools.partial(
        _rmsnorm_kernel, eps=eps, inv_d=1.0 / d_model, fast_scale=fast_scale
    )
    grid_spec = pltpu.PrefetchScalarGridSpec(
        num_scalar_prefetch=0,
        grid=grid,
        in_specs=[
            pl.BlockSpec((block_rows, d_model), lambda i: (i, 0)),
            pl.BlockSpec((1, d_model), lambda i: (0, 0)),  # grid-invariant weight
        ],
        out_specs=pl.BlockSpec((block_rows, d_model), lambda i: (i, 0)),
    )
    out_shape = jax.ShapeDtypeStruct((rows, d_model), x.dtype)

    def build(dim_semantics):
        return pl.pallas_call(
            kernel,
            out_shape=out_shape,
            grid_spec=grid_spec,
            compiler_params=pltpu.CompilerParams(
                dimension_semantics=dim_semantics,
                vmem_limit_bytes=int(vmem_limit_bytes),   # unlock large tiles
            ),
        )

    # v7x: explicitly shard the row grid across both TensorCores.  Only try it
    # for multi-block grids; fall back to plain "parallel" on parts/runtimes
    # that reject CORE_PARALLEL.
    if grid[0] > 1:
        semantics_to_try = ((pltpu.CORE_PARALLEL,), ("parallel",))
    else:
        semantics_to_try = (("parallel",),)

    out = None
    last_err = None
    for sem in semantics_to_try:
        try:
            out = build(sem)(x2d, w2d)
            break
        except Exception as e:  # fall back to the next semantics choice
            last_err = e
            out = None
    if out is None:
        raise last_err

    return out.reshape(orig_shape)


def rmsnorm_ref(x, weight, eps=1e-5):
    xf = x.astype(jnp.float32)
    ms = jnp.mean(xf * xf, axis=-1, keepdims=True)
    return (xf * jax.lax.rsqrt(ms + eps) * weight.astype(jnp.float32)).astype(x.dtype)


if __name__ == "__main__":
    key = jax.random.PRNGKey(0)

    # Primary test: shapes implied by the module (batch=2, seq=8, d_model=32),
    # weight = torch.ones(d_model).
    batch, seq, d_model = 2, 8, 32
    x = jax.random.normal(key, (batch, seq, d_model), dtype=jnp.float32)
    weight = jnp.ones((d_model,), dtype=jnp.float32)
    y = jax.block_until_ready(rmsnorm(x, weight, eps=1e-5))
    y_ref = rmsnorm_ref(x, weight, eps=1e-5)
    assert y.shape == x.shape
    assert jnp.allclose(y, y_ref, atol=1e-5, rtol=1e-5), "f32 single-block mismatch"

    # Multi-block grid with a partial last block (rows=20, block_rows=8 -> grid=3).
    k1, k2 = jax.random.split(key)
    x2 = jax.random.normal(k1, (2, 10, 128), dtype=jnp.float32)
    w2 = 1.0 + 0.1 * jax.random.normal(k2, (128,), dtype=jnp.float32)
    y2 = jax.block_until_ready(rmsnorm(x2, w2, eps=1e-5, block_rows=8))
    y2_ref = rmsnorm_ref(x2, w2, eps=1e-5)
    assert jnp.allclose(y2, y2_ref, atol=1e-5, rtol=1e-5), \
        "f32 multi-block / partial-last-block mismatch"

    # bf16 path (16-row sublane alignment + packed bf16 scale pass), partial block.
    x3 = x2.astype(jnp.bfloat16)
    w3 = w2.astype(jnp.bfloat16)
    y3 = jax.block_until_ready(rmsnorm(x3, w3, eps=1e-5, block_rows=16))
    y3_ref = rmsnorm_ref(x3, w3, eps=1e-5)
    assert jnp.allclose(y3.astype(jnp.float32), y3_ref.astype(jnp.float32),
                        atol=5e-2, rtol=5e-2), "bf16 mismatch"

    print("KERNEL_OK")
</pallas_src>

<mosaic_0001>
module attributes {stable_mosaic.version = 11 : i64} {
  func.func @_rmsnorm_kernel(%arg0: i32, %arg1: memref<16x32xf32, #tpu.memory_space<vmem>>, %arg2: memref<1x32xf32, #tpu.memory_space<vmem>>, %arg3: memref<16x32xf32, #tpu.memory_space<vmem>>) attributes {dimension_semantics = [#tpu.dimension_semantics<parallel>], iteration_bounds = array<i64: 1>, scalar_prefetch = 0 : i64, scratch_operands = 0 : i64, tpu.core_type = #tpu.core_type<tc>, window_params = [{transform_indices = @transform_0, window_bounds = array<i64: 16, 32>}, {pipeline_mode = #tpu.pipeline_mode<synchronous>, transform_indices = @transform_1, window_bounds = array<i64: 1, 32>}, {transform_indices = @transform_2, window_bounds = array<i64: 16, 32>}]} {
    %c0 = arith.constant 0 : index
    %c0_0 = arith.constant 0 : index
    %0 = vector.load %arg1[%c0, %c0_0] : memref<16x32xf32, #tpu.memory_space<vmem>>, vector<16x32xf32>
    %1 = arith.mulf %0, %0 : vector<16x32xf32>
    %cst = arith.constant dense<0.000000e+00> : vector<16xf32>
    %2 = vector.multi_reduction <add>, %1, %cst [1] : vector<16x32xf32> to vector<16xf32>
    %3 = vector.shape_cast %2 : vector<16xf32> to vector<16x1xf32>
    %cst_1 = arith.constant 3.125000e-02 : f32
    %4 = vector.broadcast %cst_1 : f32 to vector<16x1xf32>
    %5 = arith.mulf %3, %4 : vector<16x1xf32>
    %cst_2 = arith.constant 9.99999974E-6 : f32
    %6 = vector.broadcast %cst_2 : f32 to vector<16x1xf32>
    %7 = arith.addf %5, %6 : vector<16x1xf32>
    %8 = math.rsqrt %7 : vector<16x1xf32>
    %c0_3 = arith.constant 0 : index
    %c0_4 = arith.constant 0 : index
    %9 = vector.load %arg2[%c0_3, %c0_4] : memref<1x32xf32, #tpu.memory_space<vmem>>, vector<1x32xf32>
    %10 = vector.broadcast %8 : vector<16x1xf32> to vector<16x32xf32>
    %11 = arith.mulf %0, %10 : vector<16x32xf32>
    %12 = vector.broadcast %9 : vector<1x32xf32> to vector<16x32xf32>
    %13 = arith.mulf %11, %12 : vector<16x32xf32>
    %c0_5 = arith.constant 0 : index
    %c0_6 = arith.constant 0 : index
    %14 = vector.load %arg3[%c0_5, %c0_6] : memref<16x32xf32, #tpu.memory_space<vmem>>, vector<16x32xf32>
    tpu.vector_store %arg3[%c0_5, %c0_6], %13 {strides = array<i32>} : memref<16x32xf32, #tpu.memory_space<vmem>>, vector<16x32xf32>,
    return
  }
  func.func @transform_0(%arg0: i32) -> (i32, i32) {
    %c0_i32 = arith.constant 0 : i32
    %c0_i32_0 = arith.constant 0 : i32
    return %arg0, %c0_i32 : i32, i32
  }
  func.func @transform_1(%arg0: i32) -> (i32, i32) {
    %c0_i32 = arith.constant 0 : i32
    %c0_i32_0 = arith.constant 0 : i32
    %c0_i32_1 = arith.constant 0 : i32
    return %c0_i32, %c0_i32_0 : i32, i32
  }
  func.func @transform_2(%arg0: i32) -> (i32, i32) {
    %c0_i32 = arith.constant 0 : i32
    %c0_i32_0 = arith.constant 0 : i32
    return %arg0, %c0_i32 : i32, i32
  }
}

</mosaic_0001>

<bundles_post_ra>
// kernel: tpu_custom_call.1
= control target key start
LH: loop header
LB: loop body
LE: loop exit
PB: predicated region body
PF: predicated region fallthrough
CT: control target
= control target key end

     0   :  { %7 = vsyncpa [#allocation3], 0  ;;  %s164_s0 = inlined_call_operand.hbm [shape: f32[16,32], index: 0, kind: input, shape index: {}]   ;;  %s165_s1 = inlined_call_operand.vmem [shape: f32[1,32], index: 1, kind: input, shape index: {}]   ;;  %s166_s2 = inlined_call_operand.hbm [shape: f32[16,32], index: 2, kind: output, shape index: {}]  }
   0x1   :  { %8 = vsyncpa [#allocation4], 0  ;;  %s126_s9 = smov [#allocation2]  }
   0x2   :  { %s14_s10 = sshll.u32 %s126_s9, 4  ;;  %s15_s10 = int_to_ptr.vmem [resolvable:$true] %s14_s10 }
   0x3   :  { %s90_s11 = scalar_lea.vmem %s15_s10, 256  ;;  %p95_p1 = scmp.lt.s32.totalorder %s15_s10, %s15_s10 }
   0x4   :  { %p91_p0 = scmp.ne.s32.totalorder %s15_s10, %s90_s11  ;;  %p96_p2 = scmp.lt.s32.totalorder %s90_s11, %s90_s11 }
   0x6   :  { %p97_p3 = por %p96_p2, %p95_p1 }
   0x8   :  { %p98_p4 = pnand %p97_p3, %p91_p0 }
   0xa   :  { %101 = shalt.err (!%p98_p4)
}
   0xb   :  { %s127_s12 = smov 128   ;;  %s128_s13 = smov 8  }
   0xc   :  { %20 = dma.hbm_to_vmem [thread:$0]  %s164_s0, 256, %s15_s10, [#allocation3], %s127_s12, %s127_s12, %s128_s13  }
   0xd   :  { %122 = dma.done.wait [#allocation3], 256  }
   0xe   :  { %123 = vsyncadd [#allocation3], 4294967040  ;;  %v26_v0 = vld [vmem:[#allocation2] sm:$0xff]  ;;  %vm30_vm0 = vcmask 261120   ;;  %v27_v1 = vld [vmem:[#allocation2 + $0x8] sm:$0xff]  ;;  %s129_s17 = smov [#allocation5]  }
   0xf   :  { %v28_v2 = vmul.f32 %v26_v0, %v26_v0  ;;  %v29_v3 = vmul.f32 %v27_v1, %v27_v1  ;;  %v73_v13 = vld [vmem:[%s165_s1] ss:$0 sm:$0xff]  ;;  %s61_s18 = sshll.u32 %s129_s17, 4  ;;  %s62_s18 = int_to_ptr.vmem [resolvable:$true] %s61_s18 }
  0x10   :  { %s102_s19 = scalar_lea.vmem %s62_s18, 256  ;;  %p107_p6 = scmp.lt.s32.totalorder %s62_s18, %s62_s18 }
  0x11   :  { %v31_v4 = vsel %vm30_vm0, %v28_v2, 0.0  ;;  %v34_v5 = vsel %vm30_vm0, %v29_v3, 0.0  ;;  %p103_p5 = scmp.ne.s32.totalorder %s62_s18, %s102_s19  ;;  %p108_p7 = scmp.lt.s32.totalorder %s102_s19, %s102_s19 }
  0x12   :  { %32 = vadd.xlane.f32.xlu0 %v31_v4 }
  0x13   :  { %p109_p8 = por %p108_p7, %p107_p6 }
  0x15   :  { %p110_p9 = pnand %p109_p8, %p103_p5 }
  0x16   :  { %35 = vadd.xlane.f32.xlu0 %v34_v5 }
  0x9b   :  { %v33_v6 = vpop.xlane.xlu0 %32 }
  0x9c   :  { %v37_v7 = vmul.f32 0.03125, %v33_v6 }
  0x9e   :  { %v39_v8 = vadd.f32 1e-05, %v37_v7 }
  0x9f   :  { %v36_v9 = vpop.xlane.xlu0 %35 }
  0xa0   :  { %78 = vrsqrt.f32 %v39_v8  ;;  %v38_v10 = vmul.f32 0.03125, %v36_v9 }
  0xa2   :  { %v40_v11 = vadd.f32 1e-05, %v38_v10 }
  0xa4   :  { %80 = vrsqrt.f32 %v40_v11 }
  0xad   :  { %v79_v12 = vpop.eup %78 }
  0xae   :  { %v44_v14 = vmul.f32 %v79_v12, %v26_v0 }
  0xb0   :  { %v52_v15 = vmul.f32 %v73_v13, %v44_v14 }
  0xb1   :  { %v81_v16 = vpop.eup %80 }
  0xb2   :  { %v45_v17 = vmul.f32 %v81_v16, %v27_v1  ;;  %54 = vst.msk [vmem:[#allocation5] sm:$0xff] %vm30_vm0, %v52_v15 }
  0xb4   :  { %v53_v18 = vmul.f32 %v73_v13, %v45_v17 }
  0xb6   :  { %55 = vst.msk [vmem:[#allocation5 + $0x8] sm:$0xff] %vm30_vm0, %v53_v18 }
  0xb7   :  { %113 = shalt.err (!%p110_p9)
}
  0xb8   :  { %67 = dma.vmem_to_hbm [thread:$0]  %s62_s18, 256, %s166_s2, [#allocation4], %s127_s12, %s127_s12, %s128_s13  }
  0xb9   :  { %124 = dma.done.wait [#allocation4], 256  }
  0xba   :  { %125 = vsyncadd [#allocation4], 4294967040 }
  0xbb   :  { %71 = vsyncpa [#allocation3], 1 }
  0xbc   :  { %72 = vsyncpa [#allocation4], 1 }

</bundles_post_ra>
